<compile_context>
chip_gen: v7x
topology: tpu7x:2x2x1
jax: 0.10.0
libtpu: 0.0.40
codegen_flags: <defaults>
</compile_context>

<pallas_src>
import functools
import math

import jax
import jax.numpy as jnp
from jax.experimental import pallas as pl
from jax.experimental.pallas import tpu as pltpu

NEG_INF = -1000000000.0


def _vmem_limit_bytes():
    # Scoped-VMEM budget with headroom below physical capacity:
    #   v5e/v6e: 128 MiB physical -> 96 MiB; v7x: 64 MiB physical -> 48 MiB.
    try:
        cap = int(pltpu.get_tpu_info().vmem_capacity_bytes)
    except Exception:
        cap = 64 * 1024 * 1024
    return int(max(32 * 1024 * 1024, min(96 * 1024 * 1024, (cap * 3) // 4)))


def _local_attn_kernel(q_ref, kt_ref, v_ref, bias_ref, gw_ref, o_ref, *,
                       scale, win_size):
    qi = pl.program_id(1)

    q = q_ref[0]          # (TQ, Dk)   input dtype (bf16 or f32)
    kt = kt_ref[0]        # (Dk, Lk)   input dtype
    v = v_ref[0]          # (Lk, Dvp)  input dtype
    bias = bias_ref[0]    # (1, Lk)    f32: 0 where key kept, -1e9 where padded

    tq = q.shape[0]

    # Scale folded into the small q tile (Dk lanes) instead of the (TQ, Lk) plane.
    qs = q * scale

    # Scores on the MXU: plain (TQ,Dk)@(Dk,Lk), K already transposed in the wrapper.
    score = jnp.dot(qs, kt, preferred_element_type=jnp.float32)    # (TQ, Lk) f32
    score = score + bias                                           # additive padding mask

    lk = score.shape[-1]

    # Band (local-window) membership from cheap (TQ,1)/(1,Lk) iotas:
    #   keep where |j - i| <= win   <=>   0 <= (j - i + win) <= 2*win
    col = jax.lax.broadcasted_iota(jnp.int32, (1, lk), 1) + win_size   # (1, Lk)
    row = qi * tq + jax.lax.broadcasted_iota(jnp.int32, (tq, 1), 0)    # (TQ, 1)
    delta = col - row                                                  # (TQ, Lk)
    in_band = (delta >= 0) & (delta <= 2 * win_size)

    # One global softmax; the local softmax is the renormalised in-band subset.
    m = jnp.max(score, axis=-1, keepdims=True)
    p = jnp.exp(score - m)                                             # (TQ, Lk) f32
    p_loc = jnp.where(in_band, p, jnp.float32(0.0))
    g_den = jnp.sum(p, axis=-1, keepdims=True)                         # (TQ, 1)
    l_den = jnp.sum(p_loc, axis=-1, keepdims=True)                     # (TQ, 1)

    # Fusion gate: sigmoid(q . w), broadcast-mul + lane reduce (XLU; no N=1 matmul).
    gate_logit = jnp.sum(q.astype(jnp.float32) * gw_ref[...],
                         axis=-1, keepdims=True)                       # (TQ, 1)
    gate = jax.nn.sigmoid(gate_logit)

    # Exact (non-approx) division on the tiny (TQ,1) denominators.
    # tiny-floor guards rows whose in-band keys are all padding (garbage rows either
    # way; the reference produces a uniform softmax there, we produce zeros).
    tiny = jnp.float32(1e-30)
    g_coef = gate / jnp.maximum(g_den, tiny)
    l_coef = (1.0 - gate) / jnp.maximum(l_den, tiny)

    # Blend BEFORE the PV matmul -> a single (TQ,Lk)x(Lk,Dvp) MXU contraction.
    att = p * g_coef + p_loc * l_coef                                  # (TQ, Lk) f32
    out = jnp.dot(att.astype(v.dtype), v, preferred_element_type=jnp.float32)
    o_ref[0] = out.astype(o_ref.dtype)


def local_dot_product_attention(q, k, v, mask, gate_w, win_size, *,
                                compute_dtype=jnp.bfloat16, q_block=None):
    """q: (B, Lq, Dk); k: (B, Lk, Dk); v: (B, Lk, Dv); mask: (B, Lk) (truthy = keep);
    gate_w: (1, Dk) (torch nn.Linear(Dk, 1, bias=False).weight). Returns (B, Lq, Dv)
    in the original q dtype. compute_dtype controls the MXU feed (default bf16)."""
    B, Lq, Dk = q.shape
    _, Lk, Dv = v.shape
    assert k.shape == (B, Lk, Dk)
    scale = 1.0 / math.sqrt(Dk)
    out_dtype = q.dtype

    if compute_dtype is not None:
        q = q.astype(compute_dtype)
        k = k.astype(compute_dtype)
        v = v.astype(compute_dtype)

    # Pre-transpose K once -> plain (TQ,Dk)@(Dk,Lk) inside the kernel (no per-tile
    # XLU transpose of the K block, whose index is constant along the q-tile axis).
    kt = jnp.swapaxes(k, 1, 2)                                   # (B, Dk, Lk)

    # Query tile: 256 for bf16 + large Lq (v6e 256-wide MXU), else 128; sublane aligned.
    if q_block is None:
        q_block = 256 if (q.dtype == jnp.bfloat16 and Lq >= 256) else 128
    tq = q_block if Lq >= q_block else max(8, ((Lq + 7) // 8) * 8)
    lq_pad = ((Lq + tq - 1) // tq) * tq
    if lq_pad != Lq:
        q = jnp.pad(q, ((0, 0), (0, lq_pad - Lq), (0, 0)))

    # Lane-dense output stores: pad Dv up to a multiple of 128, slice after the call.
    dv_pad = ((Dv + 127) // 128) * 128
    if dv_pad != Dv:
        v = jnp.pad(v, ((0, 0), (0, 0), (0, dv_pad - Dv)))

    # Padding mask as an additive f32 bias: 0 where kept, -1e9 where padded.
    bias = ((mask.astype(jnp.float32) - 1.0) * (-NEG_INF)).reshape(B, 1, Lk)

    kernel = functools.partial(_local_attn_kernel, scale=scale,
                               win_size=int(win_size))
    grid = (B, lq_pad // tq)

    out = pl.pallas_call(
        kernel,
        out_shape=jax.ShapeDtypeStruct((B, lq_pad, dv_pad), out_dtype),
        grid_spec=pltpu.PrefetchScalarGridSpec(
            num_scalar_prefetch=0,
            grid=grid,
            in_specs=[
                pl.BlockSpec((1, tq, Dk), lambda b, i: (b, i, 0)),       # q tile
                pl.BlockSpec((1, Dk, Lk), lambda b, i: (b, 0, 0)),       # K^T per batch
                pl.BlockSpec((1, Lk, dv_pad), lambda b, i: (b, 0, 0)),   # V per batch
                pl.BlockSpec((1, 1, Lk), lambda b, i: (b, 0, 0)),        # padding bias
                pl.BlockSpec((1, Dk), lambda b, i: (0, 0)),              # gate weight
            ],
            out_specs=pl.BlockSpec((1, tq, dv_pad), lambda b, i: (b, i, 0)),
        ),
        compiler_params=pltpu.CompilerParams(
            dimension_semantics=("parallel", "parallel"),
            vmem_limit_bytes=_vmem_limit_bytes()),
    )(q, kt, v, bias, gate_w.astype(jnp.float32))

    return out[:, :Lq, :Dv]


def local_dot_product_attention_ref(q, k, v, mask, gate_w, win_size):
    """Pure-JAX reference mirroring the PyTorch forward (eval mode)."""
    Dk = q.shape[-1]
    scale = 1.0 / math.sqrt(Dk)
    score = jnp.einsum('bqd,bkd->bqk', q, k) * scale
    score = jnp.where(mask[:, None, :], score, NEG_INF)
    Lq, Lk = score.shape[1], score.shape[2]
    i = jnp.arange(Lq)[:, None]
    j = jnp.arange(Lk)[None, :]
    band = (j - i >= -win_size) & (j - i <= win_size)
    local = jnp.where(band[None, :, :], score, NEG_INF)
    g_att = jax.nn.softmax(score, axis=-1)
    l_att = jax.nn.softmax(local, axis=-1)
    g_out = jnp.einsum('bqk,bkd->bqd', g_att, v)
    l_out = jnp.einsum('bqk,bkd->bqd', l_att, v)
    gate = jax.nn.sigmoid(jnp.einsum('bqd,od->bqo', q, gate_w))
    return g_out * gate + l_out * (1.0 - gate)


if __name__ == "__main__":
    B, L, Dk, Dv = 2, 8, 32, 32
    win_size = 3   # small window so the local/band path is actually exercised at L=8

    key = jax.random.PRNGKey(0)
    kq, kk, kv, kw = jax.random.split(key, 4)
    q = jax.random.normal(kq, (B, L, Dk), jnp.float32)
    k = jax.random.normal(kk, (B, L, Dk), jnp.float32)
    v = jax.random.normal(kv, (B, L, Dv), jnp.float32)
    # Padding mask: last 2 key positions of batch 1 are padding.
    mask = jnp.ones((B, L), dtype=bool).at[1, -2:].set(False)
    # gate_fc.weight ~ N(0, 0.1), shape (1, Dk), no bias (matches reset_parameters()).
    gate_w = jax.random.normal(kw, (1, Dk), jnp.float32) * 0.1

    ref = local_dot_product_attention_ref(q, k, v, mask, gate_w, win_size)

    # Full-precision path: exact softmax denominators now (no approx reciprocal);
    # remaining slack only covers MXU-vs-XLA f32 matmul precision differences.
    out = local_dot_product_attention(q, k, v, mask, gate_w, win_size,
                                      compute_dtype=jnp.float32)
    out = jax.block_until_ready(out)
    assert out.shape == (B, L, Dv)
    err_f32 = jnp.max(jnp.abs(out - ref))
    assert jnp.allclose(out, ref, atol=5e-3, rtol=5e-3), f"f32 max abs err {err_f32}"

    # Production default path: bf16 MXU feeds (halves HBM traffic / VMEM residency).
    out_bf16 = local_dot_product_attention(q, k, v, mask, gate_w, win_size)
    out_bf16 = jax.block_until_ready(out_bf16)
    assert out_bf16.shape == (B, L, Dv)
    err_bf16 = jnp.max(jnp.abs(out_bf16.astype(jnp.float32) - ref))
    assert jnp.allclose(out_bf16.astype(jnp.float32), ref, atol=6e-2, rtol=6e-2), \
        f"bf16 max abs err {err_bf16}"

    print("KERNEL_OK")
</pallas_src>

<mosaic_0001>
module attributes {stable_mosaic.version = 11 : i64} {
  func.func @_local_attn_kernel(%arg0: i32, %arg1: i32, %arg2: memref<1x8x32xf32, #tpu.memory_space<vmem>>, %arg3: memref<1x32x8xf32, #tpu.memory_space<vmem>>, %arg4: memref<1x8x128xf32, #tpu.memory_space<vmem>>, %arg5: memref<1x1x8xf32, #tpu.memory_space<vmem>>, %arg6: memref<1x32xf32, #tpu.memory_space<vmem>>, %arg7: memref<1x8x128xf32, #tpu.memory_space<vmem>>) attributes {dimension_semantics = [#tpu.dimension_semantics<parallel>, #tpu.dimension_semantics<parallel>], iteration_bounds = array<i64: 2, 1>, scalar_prefetch = 0 : i64, scratch_operands = 0 : i64, tpu.core_type = #tpu.core_type<tc>, window_params = [{transform_indices = @transform_0, window_bounds = array<i64: 1, 8, 32>}, {transform_indices = @transform_1, window_bounds = array<i64: 1, 32, 8>}, {transform_indices = @transform_2, window_bounds = array<i64: 1, 8, 128>}, {transform_indices = @transform_3, window_bounds = array<i64: 1, 1, 8>}, {pipeline_mode = #tpu.pipeline_mode<synchronous>, transform_indices = @transform_4, window_bounds = array<i64: 1, 32>}, {transform_indices = @transform_5, window_bounds = array<i64: 1, 8, 128>}]} {
    %c0 = arith.constant 0 : index
    %c0_0 = arith.constant 0 : index
    %c0_1 = arith.constant 0 : index
    %0 = vector.load %arg2[%c0, %c0_0, %c0_1] : memref<1x8x32xf32, #tpu.memory_space<vmem>>, vector<1x8x32xf32>
    %1 = vector.shape_cast %0 : vector<1x8x32xf32> to vector<8x32xf32>
    %c0_2 = arith.constant 0 : index
    %c0_3 = arith.constant 0 : index
    %c0_4 = arith.constant 0 : index
    %2 = vector.load %arg3[%c0_2, %c0_3, %c0_4] : memref<1x32x8xf32, #tpu.memory_space<vmem>>, vector<1x32x8xf32>
    %3 = vector.shape_cast %2 : vector<1x32x8xf32> to vector<32x8xf32>
    %c0_5 = arith.constant 0 : index
    %c0_6 = arith.constant 0 : index
    %c0_7 = arith.constant 0 : index
    %4 = vector.load %arg4[%c0_5, %c0_6, %c0_7] : memref<1x8x128xf32, #tpu.memory_space<vmem>>, vector<1x8x128xf32>
    %5 = vector.shape_cast %4 : vector<1x8x128xf32> to vector<8x128xf32>
    %c0_8 = arith.constant 0 : index
    %c0_9 = arith.constant 0 : index
    %c0_10 = arith.constant 0 : index
    %6 = vector.load %arg5[%c0_8, %c0_9, %c0_10] : memref<1x1x8xf32, #tpu.memory_space<vmem>>, vector<1x1x8xf32>
    %7 = vector.shape_cast %6 : vector<1x1x8xf32> to vector<1x8xf32>
    %cst = arith.constant 0.176776692 : f32
    %8 = vector.broadcast %cst : f32 to vector<8x32xf32>
    %9 = arith.mulf %1, %8 : vector<8x32xf32>
    %cst_11 = arith.constant dense<0.000000e+00> : vector<8x8xf32>
    %10 = tpu.matmul %9, %3, %cst_11 {dimension_numbers = #tpu.dot_dimension_numbers<[1], [0], [0], [1], [0, 0, 1, 1], [], []>} : vector<8x32xf32>, vector<32x8xf32>, vector<8x8xf32> -> vector<8x8xf32>
    %11 = vector.broadcast %7 : vector<1x8xf32> to vector<8x8xf32>
    %12 = arith.addf %10, %11 : vector<8x8xf32>
    %13 = tpu.iota {dimensions = array<i32: 1>} : vector<1x8xi32>
    %c3_i32 = arith.constant 3 : i32
    %14 = vector.broadcast %c3_i32 : i32 to vector<1x8xi32>
    %15 = arith.addi %13, %14 : vector<1x8xi32>
    %c8_i32 = arith.constant 8 : i32
    %16 = arith.muli %arg1, %c8_i32 : i32
    %17 = tpu.iota {dimensions = array<i32: 0>} : vector<8x1xi32>
    %18 = vector.broadcast %16 : i32 to vector<8x1xi32>
    %19 = arith.addi %18, %17 : vector<8x1xi32>
    %20 = vector.broadcast %15 : vector<1x8xi32> to vector<8x8xi32>
    %21 = vector.broadcast %19 : vector<8x1xi32> to vector<8x8xi32>
    %22 = arith.subi %20, %21 : vector<8x8xi32>
    %c0_i32 = arith.constant 0 : i32
    %23 = vector.broadcast %c0_i32 : i32 to vector<8x8xi32>
    %24 = arith.cmpi sge, %22, %23 : vector<8x8xi32>
    %c6_i32 = arith.constant 6 : i32
    %25 = vector.broadcast %c6_i32 : i32 to vector<8x8xi32>
    %26 = arith.cmpi sle, %22, %25 : vector<8x8xi32>
    %27 = arith.andi %24, %26 : vector<8x8xi1>
    %cst_12 = arith.constant dense<0xFF800000> : vector<8xf32>
    %28 = vector.multi_reduction <maximumf>, %12, %cst_12 [1] : vector<8x8xf32> to vector<8xf32>
    %29 = vector.shape_cast %28 : vector<8xf32> to vector<8x1xf32>
    %30 = vector.broadcast %29 : vector<8x1xf32> to vector<8x8xf32>
    %31 = arith.subf %12, %30 : vector<8x8xf32>
    %32 = math.exp %31 : vector<8x8xf32>
    %cst_13 = arith.constant 0.000000e+00 : f32
    %33 = vector.broadcast %cst_13 : f32 to vector<8x8xf32>
    %34 = arith.select %27, %32, %33 : vector<8x8xi1>, vector<8x8xf32>
    %cst_14 = arith.constant dense<0.000000e+00> : vector<8xf32>
    %35 = vector.multi_reduction <add>, %32, %cst_14 [1] : vector<8x8xf32> to vector<8xf32>
    %36 = vector.shape_cast %35 : vector<8xf32> to vector<8x1xf32>
    %cst_15 = arith.constant dense<0.000000e+00> : vector<8xf32>
    %37 = vector.multi_reduction <add>, %34, %cst_15 [1] : vector<8x8xf32> to vector<8xf32>
    %38 = vector.shape_cast %37 : vector<8xf32> to vector<8x1xf32>
    %c0_16 = arith.constant 0 : index
    %c0_17 = arith.constant 0 : index
    %39 = vector.load %arg6[%c0_16, %c0_17] : memref<1x32xf32, #tpu.memory_space<vmem>>, vector<1x32xf32>
    %40 = vector.broadcast %39 : vector<1x32xf32> to vector<8x32xf32>
    %41 = arith.mulf %1, %40 : vector<8x32xf32>
    %cst_18 = arith.constant dense<0.000000e+00> : vector<8xf32>
    %42 = vector.multi_reduction <add>, %41, %cst_18 [1] : vector<8x32xf32> to vector<8xf32>
    %43 = vector.shape_cast %42 : vector<8xf32> to vector<8x1xf32>
    %44 = arith.negf %43 : vector<8x1xf32>
    %45 = math.exp %44 : vector<8x1xf32>
    %cst_19 = arith.constant 1.000000e+00 : f32
    %46 = vector.broadcast %cst_19 : f32 to vector<8x1xf32>
    %47 = arith.addf %46, %45 : vector<8x1xf32>
    %48 = arith.divf %46, %47 : vector<8x1xf32>
    %cst_20 = arith.constant 1.000000e-30 : f32
    %49 = vector.broadcast %cst_20 : f32 to vector<8x1xf32>
    %50 = arith.maximumf %36, %49 : vector<8x1xf32>
    %51 = arith.divf %48, %50 : vector<8x1xf32>
    %cst_21 = arith.constant 1.000000e+00 : f32
    %52 = vector.broadcast %cst_21 : f32 to vector<8x1xf32>
    %53 = arith.subf %52, %48 : vector<8x1xf32>
    %cst_22 = arith.constant 1.000000e-30 : f32
    %54 = vector.broadcast %cst_22 : f32 to vector<8x1xf32>
    %55 = arith.maximumf %38, %54 : vector<8x1xf32>
    %56 = arith.divf %53, %55 : vector<8x1xf32>
    %57 = vector.broadcast %51 : vector<8x1xf32> to vector<8x8xf32>
    %58 = arith.mulf %32, %57 : vector<8x8xf32>
    %59 = vector.broadcast %56 : vector<8x1xf32> to vector<8x8xf32>
    %60 = arith.mulf %34, %59 : vector<8x8xf32>
    %61 = arith.addf %58, %60 : vector<8x8xf32>
    %cst_23 = arith.constant dense<0.000000e+00> : vector<8x128xf32>
    %62 = tpu.matmul %61, %5, %cst_23 {dimension_numbers = #tpu.dot_dimension_numbers<[1], [0], [0], [1], [0, 0, 1, 1], [], []>} : vector<8x8xf32>, vector<8x128xf32>, vector<8x128xf32> -> vector<8x128xf32>
    %c0_24 = arith.constant 0 : index
    %c0_25 = arith.constant 0 : index
    %c0_26 = arith.constant 0 : index
    %63 = vector.load %arg7[%c0_24, %c0_25, %c0_26] : memref<1x8x128xf32, #tpu.memory_space<vmem>>, vector<1x8x128xf32>
    %64 = vector.shape_cast %63 : vector<1x8x128xf32> to vector<8x128xf32>
    %65 = vector.shape_cast %62 : vector<8x128xf32> to vector<1x8x128xf32>
    tpu.vector_store %arg7[%c0_24, %c0_25, %c0_26], %65 {strides = array<i32>} : memref<1x8x128xf32, #tpu.memory_space<vmem>>, vector<1x8x128xf32>,
    return
  }
  func.func @transform_0(%arg0: i32, %arg1: i32) -> (i32, i32, i32) {
    %c0_i32 = arith.constant 0 : i32
    %c0_i32_0 = arith.constant 0 : i32
    return %arg0, %arg1, %c0_i32 : i32, i32, i32
  }
  func.func @transform_1(%arg0: i32, %arg1: i32) -> (i32, i32, i32) {
    %c0_i32 = arith.constant 0 : i32
    %c0_i32_0 = arith.constant 0 : i32
    %c0_i32_1 = arith.constant 0 : i32
    return %arg0, %c0_i32, %c0_i32_0 : i32, i32, i32
  }
  func.func @transform_2(%arg0: i32, %arg1: i32) -> (i32, i32, i32) {
    %c0_i32 = arith.constant 0 : i32
    %c0_i32_0 = arith.constant 0 : i32
    %c0_i32_1 = arith.constant 0 : i32
    return %arg0, %c0_i32, %c0_i32_0 : i32, i32, i32
  }
  func.func @transform_3(%arg0: i32, %arg1: i32) -> (i32, i32, i32) {
    %c0_i32 = arith.constant 0 : i32
    %c0_i32_0 = arith.constant 0 : i32
    %c0_i32_1 = arith.constant 0 : i32
    return %arg0, %c0_i32, %c0_i32_0 : i32, i32, i32
  }
  func.func @transform_4(%arg0: i32, %arg1: i32) -> (i32, i32) {
    %c0_i32 = arith.constant 0 : i32
    %c0_i32_0 = arith.constant 0 : i32
    %c0_i32_1 = arith.constant 0 : i32
    return %c0_i32, %c0_i32_0 : i32, i32
  }
  func.func @transform_5(%arg0: i32, %arg1: i32) -> (i32, i32, i32) {
    %c0_i32 = arith.constant 0 : i32
    %c0_i32_0 = arith.constant 0 : i32
    return %arg0, %arg1, %c0_i32 : i32, i32, i32
  }
}

</mosaic_0001>

<bundles_post_ra>
// kernel: tpu_custom_call.1
= control target key start
LH: loop header
LB: loop body
LE: loop exit
PB: predicated region body
PF: predicated region fallthrough
CT: control target
= control target key end

     0   :  { %10 = vsyncpa [#allocation3], 0  ;;  %s998_s0 = inlined_call_operand.vmem [shape: f32[2,8,32], index: 0, kind: input, shape index: {}]   ;;  %s999_s1 = inlined_call_operand.vmem [shape: f32[2,32,8], index: 1, kind: input, shape index: {}]   ;;  %s1000_s2 = inlined_call_operand.vmem [shape: f32[2,8,128], index: 2, kind: input, shape index: {}]   ;;  %s1001_s3 = inlined_call_operand.vmem [shape: f32[2,1,8], index: 3, kind: input, shape index: {}]   ;;  %s1002_s4 = inlined_call_operand.vmem [shape: f32[1,32], index: 4, kind: input, shape index: {}]   ;;  %s1003_s5 = inlined_call_operand.hbm [shape: f32[2,8,128], index: 5, kind: output, shape index: {}]  }
   0x1   :  { %12 = vsyncpa [#allocation3 + $0x1], 0  ;;  %s861_s18 = smov 0   ;;  %s863_s19 = smov 0  }
   0x2   :  { %s865_s20 = smov 0   ;;  %s867_s21 = smov 0  }
   0x3   :  { %s869_s22 = smov 0   ;;  %s871_s23 = smov 0  }
   0x4 LB: > { %s630_s24 = sadd.s32 4294967295, %s825_s23   ;;  %s631_s25 = sadd.s32 4294967294, %s825_s23   ;;  %s825_s23 = sphi %s871_s23, %s18_s23   ;;  %s821_s22 = sphi %s869_s22, %s1010_s22   ;;  %s817_s21 = sphi %s867_s21, %s1009_s21   ;;  %s813_s20 = sphi %s865_s20, %s1008_s20   ;;  %s809_s19 = sphi %s863_s19, %s1007_s19   ;;  %s805_s18 = sphi %s861_s18, %s1006_s18  }
   0x5   : > { %s30_s26 = sadd.s32 1, %s821_s22  ;;  %s166_s27 = sadd.s32 1, %s813_s20 }
   0x6   : > { %p32_p0 = scmp.ge.s32.totalorder %s30_s26, 2  ;;  %p176_p1 = scmp.ne.s32.totalorder %s813_s20, %s809_s19 }
   0x7   : > { %p177_p2 = scmp.eq.s32.totalorder %s630_s24, 1  ;;  %p182_p3 = scmp.ne.s32.totalorder %s809_s19, %s805_s18 }
   0x8   : > { %s1012_s26 = smov (%p32_p0, %s30_s26), 0  ;;  %p183_p5 = scmp.eq.s32.totalorder %s631_s25, 1 }
   0x9   : > { %p901_p4 = por %p177_p2, %p176_p1  ;;  %s161_s29 = ssub.s32 %s821_s22, %s1012_s26 }
   0xa   : > { %p634_p6 = scmp.ge.s32.totalorder %s825_s23, 1  ;;  %p164_p7 = scmp.eq.s32.totalorder %s161_s29, 0 }
   0xb   : > { %p908_p8 = por %p183_p5, %p182_p3  ;;  %p235_p9 = scmp.lt.s32.totalorder %s825_s23, 3 }
   0xc   : > { %s914_s6 = scalar_select %p164_p7, %s813_s20, %s166_s27  }
   0xd   : > { %p236_p10 = pnand %p634_p6, %p235_p9 }
   0xe   : > { %p277_p11 = scmp.lt.s32.totalorder (!%p236_p10), %s817_s21, 1  ;;  %v827_v0 = vmov (!%p236_p10), 0.0|0.0   ;;  %vm828_vm0 = vmmov (!%p236_p10), 0   ;;  %v829_v1 = vmov (!%p236_p10), 0.0   ;;  %vm310_vm1 = vcmask (!%p236_p10), 261120   ;;  %s646_s13 = sshll.u32 (!%p236_p10), %s817_s21, 7 }
   0xf   : > { %239 = sbr.rel (%p236_p10) target bundleno = 800 (0x320), region = 40  ;;  %673 = vmatprep.subr.bf16.mxu0 (!%p236_p10), %v827_v0  ;;  %665 = vmatprep.mubr.msk.f32.mxu0 (!%p236_p10), %vm828_vm0, %v829_v1  ;;  %vm396_vm2 = vcmask (!%p236_p10), 64512   ;;  %v642_v15 = vld [vmem:[%s1002_s4] ss:$0 sm:$0xff] (!%p236_p10)  ;;  %v384_v18 = vlaneseq (!%p236_p10)  ;;  %s953_s16 = scalar_lea.hbm (!%p236_p10), %s1003_s5, %s646_s13 }
  0x10   : > { %668 = vmatprep.subr.mxu1 (!%p236_p10), %v829_v1  ;;  %670 = vmatprep.mubr.msk.f32.mxu1 (!%p236_p10), %vm828_vm0, %v829_v1 }
  0x11   : > { %v385_v19 = vand.u32 (!%p236_p10), 127, %v384_v18  ;;  %v389_v24 = vshrl.u32 (!%p236_p10), %v384_v18, 7 }
  0x13   : > { %v386_v23 = vadd.s32 (!%p236_p10), 3, %v385_v19 }
  0x15   : > { %v392_v25 = vsub.s32 (!%p236_p10), %v386_v23, %v389_v24 }
  0x16   : > { %s918_s7 = scalar_select %p277_p11, %s817_s21, 1 }
  0x17   : > { %vm393_vm3 = vcmp.ge.s32.totalorder %v392_v25, 0  ;;  %vm394_vm4 = vcmp.le.s32.totalorder %v392_v25, 6  ;;  %s830_s21 = smov [#allocation2]  }
  0x18   : > { %s649_s8 = sshll.u32 %s918_s7, 5  ;;  %s636_s9 = sshll.u32 %s918_s7, 3  ;;  %vm395_vm5 = vmand %vm393_vm3, %vm394_vm4 }
  0x19   : > { %s288_s12 = scalar_lea.vmem %s999_s1, %s649_s8  ;;  %s283_s15 = scalar_lea.vmem %s998_s0, %s636_s9 }
  0x1a   : > { %v297_v2 = vld [vmem:[%s288_s12] sm:$0xff]  ;;  %v298_v3 = vld [vmem:[%s288_s12 + $0x8] sm:$0xff]  ;;  %v299_v4 = vld [vmem:[%s288_s12 + $0x10] sm:$0xff]  ;;  %s295_s24 = scalar_lea.vmem %s1001_s3, %s918_s7  ;;  %s292_s10 = scalar_lea.vmem %s1000_s2, %s636_s9 }
  0x1b   : > { %v674_v5 = vpack.c.bf16 %v298_v3, %v297_v2  ;;  %v300_v6 = vld [vmem:[%s288_s12 + $0x18] sm:$0xff]  ;;  %v296_v8 = vld [vmem:[%s283_s15] sm:$0xff]  ;;  %s274_s7 = sand.u32 1, %s809_s19   ;;  %s751_s25 = sshll.u32 %s830_s21, 4  ;;  %s752_s25 = int_to_ptr.vmem [resolvable:$false] %s751_s25 }
  0x1c   : > { %v677_v7 = vpack.c.bf16 %v300_v6, %v299_v4  ;;  %v303_v9 = vmul.f32 0.17677669, %v296_v8  ;;  %v640_v10 = vld [vmem:[%s295_s24] ss:$0 sm:$0xff]  ;;  %v417_v16 = vmul.f32 %v642_v15, %v296_v8  ;;  %s635_s9 = sshll.u32 %s274_s7, 3  ;;  %s512_s17 = scalar_lea.sflag [#allocation3], %s274_s7 }
  0x1d   : > { %675 = vmatpush3.bf16.msra.mxu0 %v674_v5  ;;  %v301_v30 = vld [vmem:[%s292_s10] sm:$0xff]  ;;  %s276_s11 = scalar_lea.vmem [#allocation2], %s635_s9  ;;  %s753_s27 = scalar_lea.vmem %s752_s25, 256 }
  0x1e   : > { %676 = vmatprep.subr.bf16.mxu0 %v827_v0  ;;  %v418_v17 = vsel %vm310_vm1, %v417_v16, 0.0  ;;  %669 = vmatpush3.msra.mxu1 %v301_v30  ;;  %s526_s12 = sshll.u32 %s276_s11, 4  ;;  %s948_s12 = int_to_ptr.vmem [resolvable:$true] %s526_s12 }
  0x1f   : > { %s747_s24 = scalar_lea.vmem %s948_s12, 128  ;;  %p754_p1 = scmp.lt.s32.totalorder %s948_s12, %s752_s25 }
  0x20   : > { %p748_p12 = scmp.ne.s32.totalorder %s948_s12, %s747_s24  ;;  %p755_p2 = scmp.lt.s32.totalorder %s753_s27, %s747_s24 }
  0x21   : > { %678 = vmatpush3.bf16.msra.mxu0 %v677_v7 }
  0x22   : > { %p749_p13 = pnand %p748_p12, %p901_p4  ;;  %p756_p3 = por %p755_p2, %p754_p1 }
  0x24   : > { %666 = vmatmul.mubr.msk.f32.vlgmr.msra.gmra.mrb[0].mxu0 %vm310_vm1, %v303_v9  ;;  %p750_p0 = pneg %p749_p13 }
  0x26   : > { %p757_p5 = pnand %p756_p3, %p750_p0 }
  0xf7   : > { %v380_v11 = vpop.f32.mrb[0].mxu0 }
  0xf8   : > { %v381_v12 = vadd.f32 %v640_v10, %v380_v11  ;;  %v667_v13 = vpop.f32.mrb[1].mxu0 }
  0xfa   : > { %v397_v14 = vsel %vm396_vm2, %v381_v12, -inf }
  0xfb   : > { %398 = vmax.xlane.f32.xlu0 %v397_v14 }
  0xff   : > { %419 = vadd.xlane.f32.xlu0 %v418_v17 }
 0x188   : > { %v399_v20 = vpop.xlane.xlu0 %398 }
 0x189   : > { %v400_v21 = vsub.f32 %v381_v12, %v399_v20 }
 0x18b   : > { %v401_v22 = vmul.f32 1.442695, %v400_v21 }
 0x18c   : > { %v420_v31 = vpop.xlane.xlu0 %419 }
 0x18d   : > { %737 = vpow2.f32 %v401_v22  ;;  %v643_v32 = vmul.f32 -1.442695, %v420_v31 }
 0x18f   : > { %739 = vpow2.f32 %v643_v32 }
 0x197   : > { %v738_v26 = vpop.eup %737 }
 0x198   : > { %v404_v27 = vsel %vm396_vm2, %v738_v26, 0.0  ;;  %v403_v28 = vsel %vm395_vm5, %v738_v26, 0.0 }
 0x199   : > { %405 = vadd.xlane.f32.xlu1 %v404_v27  ;;  %v407_v29 = vsel %vm396_vm2, %v403_v28, 0.0  ;;  %v740_v33 = vpop.eup %739 }
 0x19a   : > { %v424_v34 = vadd.f32 1.0, %v740_v33 }
 0x19c   : > { %741 = vrcp.f32 %v424_v34 }
 0x19d   : > { %408 = vadd.xlane.f32.xlu1 %v407_v29 }
 0x1a6   : > { %v742_v39 = vpop.eup %741 }
 0x1a7   : > { %v430_v41 = vsub.f32 1.0, %v742_v39 }
 0x226   : > { %v406_v35 = vpop.xlane.xlu1 %405 }
 0x227   : > { %v427_v36 = vmax.f32 %v406_v35, 1e-30 }
 0x229   : > { %743 = vrcp.f32 %v427_v36 }
 0x22a   : > { %v409_v37 = vpop.xlane.xlu1 %408 }
 0x22b   : > { %v431_v38 = vmax.f32 %v409_v37, 1e-30 }
 0x22d   : > { %745 = vrcp.f32 %v431_v38 }
 0x233   : > { %v744_v40 = vpop.eup %743 }
 0x234   : > { %v429_v42 = vmul.f32 %v744_v40, %v742_v39 }
 0x236   : > { %v434_v45 = vmul.f32 %v738_v26, %v429_v42 }
 0x237   : > { %v746_v43 = vpop.eup %745 }
 0x238   : > { %v433_v44 = vmul.f32 %v746_v43, %v430_v41 }
 0x23a   : > { %v435_v46 = vmul.f32 %v433_v44, %v403_v28 }
 0x23c   : > { %v436_v47 = vadd.f32 %v435_v46, %v434_v45 }
 0x23e   : > { %671 = vmatmul.mubr.msk.f32.vlgmr.msra.gmra.mrb[0].mxu1 %vm396_vm2, %v436_v47 }
 0x311   : > { %v506_v48 = vpop.f32.mrb[0].mxu1 }
 0x312   : > { %510 = vst [vmem:[%s276_s11] sm:$0xff] %v506_v48  ;;  %v672_v49 = vpop.f32.mrb[1].mxu1 }
 0x313   : > { %760 = shalt.err (!%p757_p5)
}
 0x314   : > { %s761_s29 = scalar_lea.hbm %s953_s16, 128  ;;  %s765_s7 = scalar_lea.hbm %s1003_s5, 256 }
 0x315   : > { %p762_p6 = scmp.ne.s32.totalorder %s953_s16, %s761_s29  ;;  %p766_p10 = scmp.lt.u32.totalorder %s953_s16, %s1003_s5 }
 0x316   : > { %p767_p11 = scmp.lt.u32.totalorder %s765_s7, %s761_s29  ;;  %p769_p13 = scmp.lt.u32.totalorder %s761_s29, %s953_s16 }
 0x317   : > { %p763_p7 = pnand %p762_p6, %p901_p4 }
 0x318   : > { %p768_p12 = por %p767_p11, %p766_p10 }
 0x319   : > { %p764_p9 = pneg %p763_p7 }
 0x31a   : > { %p770_p0 = por %p769_p13, %p768_p12 }
 0x31c   : > { %p771_p1 = pnand %p770_p0, %p764_p9 }
 0x31e   : > { %774 = shalt.err (!%p771_p1)
}
 0x31f   : > { %679 = dma.vmem_to_hbm [thread:$0]  (%p901_p4), %s948_s12, 128, %s953_s16, %s512_s17  }
 0x320 PF: > { %p685_p2 = scmp.ge.s32.totalorder %s825_s23, 2  ;;  %s538_s13 = sand.u32 1, %s805_s18  }
 0x321   : > { %s539_s14 = scalar_lea.sflag [#allocation3], %s538_s13 }
 0x322   : > { %p682_p3 = pnand %p685_p2, %p908_p8 }
 0x324   : > { %800 = dma.done.wait (!%p682_p3), %s539_s14, 128  }
 0x325   : > { %802 = vsyncadd (!%p682_p3), %s539_s14, 4294967168  ;;  %s18_s23 = sadd.s32 1, %s825_s23   ;;  %s1006_s18 = smov %s809_s19 }
 0x326   : > { %p15_p5 = scmp.ge.s32.totalorder %s18_s23, 4   ;;  %s1007_s19 = smov %s813_s20 }
 0x327   : > { %s1008_s20 = smov %s914_s6  ;;  %s1009_s21 = smov %s821_s22 }
 0x328   : > { %s1010_s22 = smov %s1012_s26  ;;  %17 = sbr.rel (!%p15_p5) target bundleno = 4 (0x4), region = 84 }
 0x32f   :  { %544 = vsyncpa [#allocation3], 1 }
 0x330   :  { %546 = vsyncpa [#allocation3 + $0x1], 1 }

</bundles_post_ra>
